<compile_context>
chip_gen: v5e
topology: v5e:2x2
jax: 0.10.0
libtpu: 0.0.40
codegen_flags: <defaults>
</compile_context>

<pallas_src>
import jax
import jax.numpy as jnp
from jax.experimental import pallas as pl
from jax.experimental.pallas import tpu as pltpu


def ann_kernel(xt_ref, w1t_ref, b1t_ref, w23t_ref, b23t_ref, ot_ref):
    # xt_ref:   (4, TB)   input tile, batch on the 128-lane axis
    # w1t_ref:  (10, 4)   W1^T
    # b1t_ref:  (10, 1)
    # w23t_ref: (C, 10)   (W2 @ W3)^T
    # b23t_ref: (C, 1)    (b2 @ W3 + b3)^T
    # ot_ref:   (C, TB)   output tile (lane-dense, unmasked in-kernel stores)
    h1 = jnp.dot(w1t_ref[...], xt_ref[...], preferred_element_type=jnp.float32)
    h1 = jnp.maximum(h1 + b1t_ref[...], 0.0)
    out = jnp.dot(w23t_ref[...], h1, preferred_element_type=jnp.float32)
    ot_ref[...] = out + b23t_ref[...]


def prepare_params(params):
    """Precompute (once per weight update) fused, feature-major weights.

    Layers 2 and 3 have no nonlinearity between them, so they fuse exactly:
        W23 = W2 @ W3,  b23 = b2 @ W3 + b3.
    Cache the result outside the jitted forward path.
    """
    w23 = params["w2"] @ params["w3"]                 # (10, C)
    b23 = params["b2"] @ params["w3"] + params["b3"]  # (1, C)
    return {
        "w1t": params["w1"].T,    # (10, 4)
        "b1t": params["b1"].T,    # (10, 1)
        "w23t": w23.T,            # (C, 10)
        "b23t": b23.T,            # (C, 1)
    }


def ann_forward_feature_major(xt, prepared, *, tile_batch=32768):
    """Fused MLP forward on feature-major data (zero wrapper-side copies).

    xt: (4, batch) float32, batch on the last (lane) axis.
    Returns (n_classes, batch) float32.

    tile_batch: lanes per grid step. 32768 is a good default for v5e/v6e;
    pass 131072-262144 on v7x to keep per-step DMA >> step overhead at
    3.2 TB/s HBM (vmem_limit_bytes is sized accordingly below).
    """
    _, batch = xt.shape
    n_classes = prepared["w23t"].shape[0]

    # Lane-aligned tile, large enough to amortize the ~0.35 us per-step
    # pipeline overhead.
    tb = max(128, (int(tile_batch) // 128) * 128)
    tb = min(tb, 262144)                  # double-buffered tiles <= ~33 MiB
    nblocks = pl.cdiv(batch, 128)         # number of 128-lane blocks in batch
    if nblocks >= 2:
        # At least 2 grid steps so the "parallel" axis uses both TCs on v7x.
        tb = min(tb, pl.cdiv(nblocks, 2) * 128)
    else:
        tb = 128
    grid = (pl.cdiv(batch, tb),)

    # x/out tiles are sublane-padded to 8 rows of f32; 2 arrays x 2 buffers.
    tile_vmem_bytes = 2 * 2 * (8 * tb * 4)
    vmem_limit = int(min(max(tile_vmem_bytes + (4 << 20), 16 << 20), 48 << 20))

    return pl.pallas_call(
        ann_kernel,
        out_shape=jax.ShapeDtypeStruct((n_classes, batch), jnp.float32),
        grid=grid,
        in_specs=[
            # x tile slides along the batch (lane) axis; partial last block
            # (or a single undersized block) is masked by Pallas.
            pl.BlockSpec((4, tb), lambda i: (0, i)),
            # Weights/biases: constant index_map -> DMA'd once, VMEM-resident.
            pl.BlockSpec(prepared["w1t"].shape, lambda i: (0, 0)),
            pl.BlockSpec(prepared["b1t"].shape, lambda i: (0, 0)),
            pl.BlockSpec(prepared["w23t"].shape, lambda i: (0, 0)),
            pl.BlockSpec(prepared["b23t"].shape, lambda i: (0, 0)),
        ],
        out_specs=pl.BlockSpec((n_classes, tb), lambda i: (0, i)),
        compiler_params=pltpu.CompilerParams(
            dimension_semantics=("parallel",),
            vmem_limit_bytes=vmem_limit,
        ),
    )(xt, prepared["w1t"], prepared["b1t"], prepared["w23t"], prepared["b23t"])


def ann_forward(x, params, *, tile_batch=32768):
    """Drop-in forward matching the PyTorch module: (batch, 4) -> (batch, C).

    NOTE: the x.T / out.T here are extra HBM round-trips imposed by the
    batch-major API contract; bandwidth-sensitive callers should feed
    feature-major data to ann_forward_feature_major directly and cache
    prepare_params(params) across calls.
    """
    prepared = prepare_params(params)
    out_t = ann_forward_feature_major(x.T, prepared, tile_batch=tile_batch)
    return out_t.T


def init_params(key, n_classes):
    """Deterministic init mirroring nn.Linear shapes (weights stored transposed)."""
    k1, k2, k3, k4, k5, k6 = jax.random.split(key, 6)

    def linear(kw, kb, fan_in, fan_out):
        bound = 1.0 / jnp.sqrt(fan_in)
        w = jax.random.uniform(kw, (fan_in, fan_out), jnp.float32, -bound, bound)
        b = jax.random.uniform(kb, (1, fan_out), jnp.float32, -bound, bound)
        return w, b

    w1, b1 = linear(k1, k2, 4, 10)
    w2, b2 = linear(k3, k4, 10, 10)
    w3, b3 = linear(k5, k6, 10, n_classes)
    return {"w1": w1, "b1": b1, "w2": w2, "b2": b2, "w3": w3, "b3": b3}


def ann_reference(x, p):
    """Pure-JAX reference of the unfused forward pass (correctness check)."""
    h1 = jnp.maximum(x @ p["w1"] + p["b1"], 0.0)
    h2 = h1 @ p["w2"] + p["b2"]
    return h2 @ p["w3"] + p["b3"]


if __name__ == "__main__":
    n_classes = 3
    key = jax.random.PRNGKey(0)
    kx, kp, kx2 = jax.random.split(key, 3)
    params = init_params(kp, n_classes)

    # Small batch: single (partial) 128-lane block, through the drop-in API.
    batch = 8
    x = jax.random.normal(kx, (batch, 4), jnp.float32)
    out = jax.block_until_ready(ann_forward(x, params))
    ref = ann_reference(x, params)
    assert out.shape == (batch, n_classes)
    assert jnp.allclose(out, ref, atol=1e-4, rtol=1e-4)

    # Non-aligned batch exercising a 2-step grid with a partial last block,
    # through the zero-copy feature-major entry point.
    batch2 = 300
    x2 = jax.random.normal(kx2, (batch2, 4), jnp.float32)
    prepared = prepare_params(params)
    out2_t = jax.block_until_ready(ann_forward_feature_major(x2.T, prepared))
    ref2 = ann_reference(x2, params)
    assert out2_t.shape == (n_classes, batch2)
    assert jnp.allclose(out2_t.T, ref2, atol=1e-4, rtol=1e-4)

    print("KERNEL_OK")
</pallas_src>

<mosaic_0001>
module attributes {stable_mosaic.version = 11 : i64} {
  func.func @ann_kernel(%arg0: i32, %arg1: memref<4x128xf32, #tpu.memory_space<vmem>>, %arg2: memref<10x4xf32, #tpu.memory_space<vmem>>, %arg3: memref<10x1xf32, #tpu.memory_space<vmem>>, %arg4: memref<3x10xf32, #tpu.memory_space<vmem>>, %arg5: memref<3x1xf32, #tpu.memory_space<vmem>>, %arg6: memref<3x128xf32, #tpu.memory_space<vmem>>) attributes {dimension_semantics = [#tpu.dimension_semantics<parallel>], iteration_bounds = array<i64: 1>, scalar_prefetch = 0 : i64, scratch_operands = 0 : i64, tpu.core_type = #tpu.core_type<tc>, window_params = [{transform_indices = @transform_0, window_bounds = array<i64: 4, 128>}, {pipeline_mode = #tpu.pipeline_mode<synchronous>, transform_indices = @transform_1, window_bounds = array<i64: 10, 4>}, {pipeline_mode = #tpu.pipeline_mode<synchronous>, transform_indices = @transform_2, window_bounds = array<i64: 10, 1>}, {pipeline_mode = #tpu.pipeline_mode<synchronous>, transform_indices = @transform_3, window_bounds = array<i64: 3, 10>}, {pipeline_mode = #tpu.pipeline_mode<synchronous>, transform_indices = @transform_4, window_bounds = array<i64: 3, 1>}, {transform_indices = @transform_5, window_bounds = array<i64: 3, 128>}]} {
    %c0 = arith.constant 0 : index
    %c0_0 = arith.constant 0 : index
    %0 = vector.load %arg2[%c0, %c0_0] : memref<10x4xf32, #tpu.memory_space<vmem>>, vector<10x4xf32>
    %c0_1 = arith.constant 0 : index
    %c0_2 = arith.constant 0 : index
    %1 = vector.load %arg1[%c0_1, %c0_2] : memref<4x128xf32, #tpu.memory_space<vmem>>, vector<4x128xf32>
    %cst = arith.constant dense<0.000000e+00> : vector<10x128xf32>
    %2 = tpu.matmul %0, %1, %cst {dimension_numbers = #tpu.dot_dimension_numbers<[1], [0], [0], [1], [0, 0, 1, 1], [], []>} : vector<10x4xf32>, vector<4x128xf32>, vector<10x128xf32> -> vector<10x128xf32>
    %c0_3 = arith.constant 0 : index
    %c0_4 = arith.constant 0 : index
    %3 = vector.load %arg3[%c0_3, %c0_4] : memref<10x1xf32, #tpu.memory_space<vmem>>, vector<10x1xf32>
    %4 = vector.broadcast %3 : vector<10x1xf32> to vector<10x128xf32>
    %5 = arith.addf %2, %4 : vector<10x128xf32>
    %cst_5 = arith.constant 0.000000e+00 : f32
    %6 = vector.broadcast %cst_5 : f32 to vector<10x128xf32>
    %7 = arith.maximumf %5, %6 : vector<10x128xf32>
    %c0_6 = arith.constant 0 : index
    %c0_7 = arith.constant 0 : index
    %8 = vector.load %arg4[%c0_6, %c0_7] : memref<3x10xf32, #tpu.memory_space<vmem>>, vector<3x10xf32>
    %cst_8 = arith.constant dense<0.000000e+00> : vector<3x128xf32>
    %9 = tpu.matmul %8, %7, %cst_8 {dimension_numbers = #tpu.dot_dimension_numbers<[1], [0], [0], [1], [0, 0, 1, 1], [], []>} : vector<3x10xf32>, vector<10x128xf32>, vector<3x128xf32> -> vector<3x128xf32>
    %c0_9 = arith.constant 0 : index
    %c0_10 = arith.constant 0 : index
    %10 = vector.load %arg5[%c0_9, %c0_10] : memref<3x1xf32, #tpu.memory_space<vmem>>, vector<3x1xf32>
    %11 = vector.broadcast %10 : vector<3x1xf32> to vector<3x128xf32>
    %12 = arith.addf %9, %11 : vector<3x128xf32>
    %c0_11 = arith.constant 0 : index
    %c0_12 = arith.constant 0 : index
    %13 = vector.load %arg6[%c0_11, %c0_12] : memref<3x128xf32, #tpu.memory_space<vmem>>, vector<3x128xf32>
    tpu.vector_store %arg6[%c0_11, %c0_12], %12 {strides = array<i32>} : memref<3x128xf32, #tpu.memory_space<vmem>>, vector<3x128xf32>,
    return
  }
  func.func @transform_0(%arg0: i32) -> (i32, i32) {
    %c0_i32 = arith.constant 0 : i32
    %c0_i32_0 = arith.constant 0 : i32
    return %c0_i32, %arg0 : i32, i32
  }
  func.func @transform_1(%arg0: i32) -> (i32, i32) {
    %c0_i32 = arith.constant 0 : i32
    %c0_i32_0 = arith.constant 0 : i32
    %c0_i32_1 = arith.constant 0 : i32
    return %c0_i32, %c0_i32_0 : i32, i32
  }
  func.func @transform_2(%arg0: i32) -> (i32, i32) {
    %c0_i32 = arith.constant 0 : i32
    %c0_i32_0 = arith.constant 0 : i32
    %c0_i32_1 = arith.constant 0 : i32
    return %c0_i32, %c0_i32_0 : i32, i32
  }
  func.func @transform_3(%arg0: i32) -> (i32, i32) {
    %c0_i32 = arith.constant 0 : i32
    %c0_i32_0 = arith.constant 0 : i32
    %c0_i32_1 = arith.constant 0 : i32
    return %c0_i32, %c0_i32_0 : i32, i32
  }
  func.func @transform_4(%arg0: i32) -> (i32, i32) {
    %c0_i32 = arith.constant 0 : i32
    %c0_i32_0 = arith.constant 0 : i32
    %c0_i32_1 = arith.constant 0 : i32
    return %c0_i32, %c0_i32_0 : i32, i32
  }
  func.func @transform_5(%arg0: i32) -> (i32, i32) {
    %c0_i32 = arith.constant 0 : i32
    %c0_i32_0 = arith.constant 0 : i32
    return %c0_i32, %arg0 : i32, i32
  }
}

</mosaic_0001>

<bundles_post_ra>
// kernel: tpu_custom_call.1
= control target key start
LH: loop header
LB: loop body
LE: loop exit
PB: predicated region body
PF: predicated region fallthrough
CT: control target
= control target key end

     0   :  { %vm43_vm0 = vcmask 1043456   ;;  %vm36_vm1 = vcmask 31744   ;;  %s216_s0 = inlined_call_operand.vmem [shape: f32[4,8], index: 0, kind: input, shape index: {}]   ;;  %s217_s1 = inlined_call_operand.vmem [shape: f32[10,4], index: 1, kind: input, shape index: {}]   ;;  %s218_s2 = inlined_call_operand.vmem [shape: f32[10,1], index: 2, kind: input, shape index: {}]   ;;  %s219_s3 = inlined_call_operand.vmem [shape: f32[3,10], index: 3, kind: input, shape index: {}]   ;;  %s220_s4 = inlined_call_operand.vmem [shape: f32[3,1], index: 4, kind: input, shape index: {}]   ;;  %s221_s5 = inlined_call_operand.hbm [shape: f32[3,8], index: 5, kind: output, shape index: {}]  }
   0x1   :  { %v23_v0 = vld [vmem:[%s216_s0] sm:$0xf]  ;;  %v22_v2 = vld [vmem:[%s217_s1 + $0x8] sm:$0x3] }
   0x2   :  { %v21_v1 = vld [vmem:[%s217_s1] sm:$0xff]  ;;  %124 = vmatpush.msk.msra.mxu0 %vm43_vm0, %v23_v0  ;;  %129 = vmatpush.msk.msra.mxu2 %vm43_vm0, %v23_v0  ;;  %v25_v3 = vld [vmem:[%s218_s2 + $0x8] sm:$0x3] }
   0x3   :  { %125 = vmatmul.msk.f32.vlgmr.msra.gmra.mxu0 %vm36_vm1, %v21_v1  ;;  %126 = vmatmul.msk.f32.vlgmr.msra.gmra.mxu2 %vm36_vm1, %v22_v2 }
   0x4   :  { %10 = vsyncpa [#allocation3], 0  ;;  %v160_v4 = vmov 0   ;;  %v24_v5 = vld [vmem:[%s218_s2] sm:$0xff]  ;;  %vm83_vm2 = vcmask 1041408   ;;  %vm79_vm3 = vcmask 80896  }
   0x5   :  { %132 = vset.pattern.permute.xlu0 %v160_v4  ;;  %133 = vset.pattern.permute.xlu1 %v160_v4  ;;  %v73_v6 = vld [vmem:[%s220_s4] sm:$0x7]  ;;  %s161_s2 = smov [#allocation2]   ;;  %s115_s7 = sshll.u32 %s221_s5, 4  ;;  %s116_s7 = int_to_ptr.hbm [resolvable:$true] %s115_s7 }
   0x6   :  { %33 = vperm.xlu0 %132, %v25_v3   ;;  %76 = vperm.xlu1 %133, %v73_v6   ;;  %v72_v15 = vld [vmem:[%s219_s3] sm:$0x7]  ;;  %s113_s4 = sshll.u32 %s161_s2, 4  ;;  %s114_s4 = int_to_ptr.vmem [resolvable:$true] %s113_s4 }
   0xe   :  { %28 = vperm.xlu0 %132, %v24_v5  }
  0x78   :  { %v34_v7 = vpop.permute.xlu0 %33  ;;  %v77_v16 = vpop.permute.xlu1 %76 }
  0x80   :  { %v29_v8 = vpop.permute.xlu0 %28  ;;  %v64_v9 = vpop.f32.mrf.mxu0 }
  0x81   :  { %v65_v11 = vadd.f32 %v64_v9, %v29_v8 }
  0x83   :  { %v70_v14 = vmax.f32 %v65_v11, 0.0 }
  0x86   :  { %v67_v10 = vpop.f32.mrf.mxu2 }
  0x87   :  { %v68_v12 = vadd.f32 %v67_v10, %v34_v7 }
  0x89   :  { %v71_v13 = vmax.f32 %v68_v12, 0.0 }
  0x8b   :  { %127 = vmatpush.msk.msra.mxu1 %vm83_vm2, %v71_v13 }
  0x8d   :  { %102 = vmatpush.msra.mxu1 %v70_v14 }
  0x8e   :  { %128 = vmatmul.msk.f32.vlgmr.msra.gmra.mxu1 %vm79_vm3, %v72_v15 }
 0x10b   :  { %v104_v17 = vpop.f32.mrf.mxu1 }
 0x10c   :  { %v105_v18 = vadd.f32 %v104_v17, %v77_v16 }
 0x10e   :  { %107 = vst [vmem:[#allocation2] sm:$0x7] %v105_v18 }
 0x10f   :  { %118 = dma.vmem_to_hbm [thread:$0]  %s114_s4, 64, %s116_s7, [#allocation3]  }
 0x110   :  { %158 = dma.done.wait [#allocation3], 64  }
 0x111   :  { %159 = vsyncadd [#allocation3], 4294967232 }
 0x112   :  { %123 = vsyncpa [#allocation3], 1 }

</bundles_post_ra>
